<compile_context>
chip_gen: v7x
topology: tpu7x:2x2x1
jax: 0.10.0
libtpu: 0.0.40
codegen_flags: <defaults>
</compile_context>

<pallas_src>
import functools

import jax
import jax.numpy as jnp
from jax.experimental import pallas as pl
from jax.experimental.pallas import tpu as pltpu


# ----------------------------------------------------------------------------
# Shared conv helper: k=3, stride=1, pad=1 conv for one batch element.
# ----------------------------------------------------------------------------
def _conv_taps(x_ref, w_ref, bi):
    """Returns the (Cout, L) f32 conv output (no bias) for batch element bi."""
    xb = x_ref[bi]                                           # (Cin, L)
    _, L = xb.shape

    # Shifted copies via XLU roll + masked wrap column (zero padding of the
    # conv) -- no lane-slice concatenation, no extra VMEM copies.
    lane = jax.lax.broadcasted_iota(jnp.int32, xb.shape, 1)
    zero = jnp.zeros_like(xb)
    x_m1 = jnp.where(lane == 0, zero, pltpu.roll(xb, 1, 1))          # x[:, l-1]
    x_p1 = jnp.where(lane == L - 1, zero, pltpu.roll(xb, L - 1, 1))  # x[:, l+1]

    # Three accumulating MXU matmuls, one per tap: (Cout, Cin) @ (Cin, L).
    acc = jnp.dot(w_ref[0], x_m1, preferred_element_type=jnp.float32)
    acc += jnp.dot(w_ref[1], xb, preferred_element_type=jnp.float32)
    acc += jnp.dot(w_ref[2], x_p1, preferred_element_type=jnp.float32)
    return acc                                               # (Cout, L) f32


# ----------------------------------------------------------------------------
# Fused conv + BatchNorm(batch stats) + ReLU.  Grid = (pass, batch_block).
#   pass 0: accumulate per-channel stats; finalize scale/shift on last block.
#   pass 1: recompute conv, apply scale/shift + ReLU, write output once.
# ----------------------------------------------------------------------------
def conv_bn_relu_kernel(x_ref, w_ref, gamma_ref, beta_ref, o_ref,
                        sum_ref, ssq_ref, scale_ref, shift_ref,
                        *, inv_count, eps):
    p = pl.program_id(0)            # 0: stats pass, 1: apply pass
    blk = pl.program_id(1)
    nblk = pl.num_programs(1)
    bn = x_ref.shape[0]

    @pl.when((p == 0) & (blk == 0))
    def _init():
        sum_ref[...] = jnp.zeros_like(sum_ref)
        ssq_ref[...] = jnp.zeros_like(ssq_ref)

    # Conv is recomputed in both passes; its FLOPs (K = 3*Cin) are negligible
    # next to the HBM round-trip it replaces.
    accs = [_conv_taps(x_ref, w_ref, bi) for bi in range(bn)]

    @pl.when(p == 0)
    def _accumulate():
        s = sum(jnp.sum(a, axis=1, keepdims=True) for a in accs)        # (Cout,1)
        ss = sum(jnp.sum(a * a, axis=1, keepdims=True) for a in accs)   # (Cout,1)
        sum_ref[...] += s
        ssq_ref[...] += ss

    @pl.when((p == 0) & (blk == nblk - 1))
    def _finalize():
        mean = sum_ref[...] * inv_count
        var = jnp.maximum(ssq_ref[...] * inv_count - mean * mean, 0.0)
        scale = gamma_ref[...] * jax.lax.rsqrt(var + eps)
        scale_ref[...] = scale
        shift_ref[...] = beta_ref[...] - mean * scale

    @pl.when(p == 1)
    def _apply():
        scale = scale_ref[...]                               # (Cout, 1)
        shift = shift_ref[...]
        for bi in range(bn):
            o_ref[bi] = jnp.maximum(accs[bi] * scale + shift, 0.0
                                    ).astype(o_ref.dtype)


# ----------------------------------------------------------------------------
# is_output=True path: conv + bias only (no BN / ReLU, no stats).
# ----------------------------------------------------------------------------
def conv_bias_kernel(x_ref, w_ref, b_ref, o_ref):
    bn = x_ref.shape[0]
    bias = b_ref[...]                                        # (Cout, 1) f32
    for bi in range(bn):
        o_ref[bi] = (_conv_taps(x_ref, w_ref, bi) + bias).astype(o_ref.dtype)


# ----------------------------------------------------------------------------
# Wrapper
# ----------------------------------------------------------------------------
def _pick_batch_block(n, cin, cout, L, itemsize, budget_bytes=6 * 1024 * 1024):
    """Largest divisor of n whose per-block working set stays under budget
    (input + 2 shifted copies + f32 acc + output), leaving plenty of headroom
    for double-buffering even on v7x's 64 MiB VMEM."""
    per_batch = L * (3 * cin * itemsize + cout * (4 + itemsize))
    bn = int(max(1, min(n, budget_bytes // max(per_batch, 1))))
    while n % bn:
        bn -= 1
    return bn


@functools.partial(jax.jit, static_argnames=("is_output",))
def conv_unit(x_ncl, w, b, gamma, beta, *, is_output: bool = False):
    """ConvUnit forward.

    x_ncl : (N, Cin, L)     PyTorch Conv1d input layout.
    w     : (Cout, Cin, 3)  PyTorch Conv1d weight.
    b     : (Cout,)         Conv1d bias.
    gamma, beta : (Cout,)   BatchNorm1d affine parameters.
    """
    N, cin, L = x_ncl.shape
    cout = w.shape[0]
    dtype = x_ncl.dtype

    # Per-tap weights (3, Cout, Cin); tap k multiplies x[:, :, l + k - 1].
    w_t = jnp.transpose(w, (2, 0, 1)).astype(dtype)

    bn = _pick_batch_block(N, cin, cout, L, jnp.dtype(dtype).itemsize)
    nblk = N // bn

    if is_output:
        return pl.pallas_call(
            conv_bias_kernel,
            out_shape=jax.ShapeDtypeStruct((N, cout, L), dtype),
            grid=(nblk,),
            in_specs=[
                pl.BlockSpec((bn, cin, L), lambda i: (i, 0, 0)),
                pl.BlockSpec((3, cout, cin), lambda i: (0, 0, 0)),
                pl.BlockSpec((cout, 1), lambda i: (0, 0)),
            ],
            out_specs=pl.BlockSpec((bn, cout, L), lambda i: (i, 0, 0)),
            compiler_params=pltpu.CompilerParams(
                dimension_semantics=("parallel",),
                vmem_limit_bytes=64 * 1024 * 1024,
            ),
        )(x_ncl, w_t, b.reshape(cout, 1).astype(jnp.float32))

    # BN path: bias is dropped entirely (mean subtraction cancels it), so it
    # is never DMA'd.  Batch statistics are accumulated in VMEM scratch, never
    # written to HBM.
    kernel = functools.partial(conv_bn_relu_kernel,
                               inv_count=1.0 / float(N * L), eps=1e-5)

    return pl.pallas_call(
        kernel,
        out_shape=jax.ShapeDtypeStruct((N, cout, L), dtype),
        grid=(2, nblk),                                  # (pass, batch block)
        in_specs=[
            pl.BlockSpec((bn, cin, L), lambda p, i: (i, 0, 0)),
            pl.BlockSpec((3, cout, cin), lambda p, i: (0, 0, 0)),
            pl.BlockSpec((cout, 1), lambda p, i: (0, 0)),
            pl.BlockSpec((cout, 1), lambda p, i: (0, 0)),
        ],
        # Pass 0 never writes the output; parking its block index at 0 means
        # every output block is DMA'd to HBM exactly once (after pass 1).
        out_specs=pl.BlockSpec((bn, cout, L), lambda p, i: (i * p, 0, 0)),
        scratch_shapes=[pltpu.VMEM((cout, 1), jnp.float32)] * 4,
        compiler_params=pltpu.CompilerParams(
            # Stats accumulation couples every grid step -> sequential.
            dimension_semantics=("arbitrary", "arbitrary"),
            vmem_limit_bytes=64 * 1024 * 1024,
        ),
    )(x_ncl, w_t,
      gamma.reshape(cout, 1).astype(jnp.float32),
      beta.reshape(cout, 1).astype(jnp.float32))


# ----------------------------------------------------------------------------
# Pure-JAX reference (PyTorch forward semantics, training-mode BN).
# ----------------------------------------------------------------------------
def _reference(x_ncl, w, b, gamma, beta, *, is_output: bool = False):
    y = jax.lax.conv_general_dilated(
        x_ncl, w, window_strides=(1,), padding=((1, 1),),
        dimension_numbers=("NCH", "OIH", "NCH"))
    y = y + b.reshape(1, -1, 1)
    if not is_output:
        mean = jnp.mean(y, axis=(0, 2), keepdims=True)
        var = jnp.mean((y - mean) ** 2, axis=(0, 2), keepdims=True)
        y = (y - mean) * jax.lax.rsqrt(var + 1e-5)
        y = y * gamma.reshape(1, -1, 1) + beta.reshape(1, -1, 1)
        y = jnp.maximum(y, 0.0)
    return y


if __name__ == "__main__":
    # Small shapes consistent with the module: ConvUnit(in_ch=4, out_ch=8).
    N, Cin, Cout, L = 2, 4, 8, 16

    key = jax.random.PRNGKey(0)
    kx, kw, kb, kg, kbeta = jax.random.split(key, 5)

    x = jax.random.normal(kx, (N, Cin, L), dtype=jnp.float32)
    w = jax.random.normal(kw, (Cout, Cin, 3), dtype=jnp.float32) * 0.1
    b = jax.random.normal(kb, (Cout,), dtype=jnp.float32) * 0.1
    gamma = 1.0 + 0.1 * jax.random.normal(kg, (Cout,), dtype=jnp.float32)
    beta = 0.1 * jax.random.normal(kbeta, (Cout,), dtype=jnp.float32)

    out = jax.block_until_ready(conv_unit(x, w, b, gamma, beta, is_output=False))
    ref = _reference(x, w, b, gamma, beta, is_output=False)
    assert out.shape == (N, Cout, L)
    assert jnp.allclose(out, ref, atol=2e-4, rtol=1e-3), "mismatch (BN path)"

    # Also exercise the is_output=True path (conv + bias only, no BN/ReLU).
    out2 = jax.block_until_ready(conv_unit(x, w, b, gamma, beta, is_output=True))
    ref2 = _reference(x, w, b, gamma, beta, is_output=True)
    assert out2.shape == (N, Cout, L)
    assert jnp.allclose(out2, ref2, atol=2e-4, rtol=1e-3), "mismatch (is_output)"

    print("KERNEL_OK")
</pallas_src>

<mosaic_0001>
module attributes {stable_mosaic.version = 11 : i64} {
  func.func @conv_bn_relu_kernel(%arg0: i32, %arg1: i32, %arg2: memref<2x4x16xf32, #tpu.memory_space<vmem>>, %arg3: memref<3x8x4xf32, #tpu.memory_space<vmem>>, %arg4: memref<8x1xf32, #tpu.memory_space<vmem>>, %arg5: memref<8x1xf32, #tpu.memory_space<vmem>>, %arg6: memref<2x8x16xf32, #tpu.memory_space<vmem>>, %arg7: memref<8x1xf32, #tpu.memory_space<vmem>>, %arg8: memref<8x1xf32, #tpu.memory_space<vmem>>, %arg9: memref<8x1xf32, #tpu.memory_space<vmem>>, %arg10: memref<8x1xf32, #tpu.memory_space<vmem>>) attributes {dimension_semantics = [#tpu.dimension_semantics<arbitrary>, #tpu.dimension_semantics<arbitrary>], iteration_bounds = array<i64: 2, 1>, scalar_prefetch = 0 : i64, scratch_operands = 4 : i64, tpu.core_type = #tpu.core_type<tc>, window_params = [{transform_indices = @transform_0, window_bounds = array<i64: 2, 4, 16>}, {pipeline_mode = #tpu.pipeline_mode<synchronous>, transform_indices = @transform_1, window_bounds = array<i64: 3, 8, 4>}, {pipeline_mode = #tpu.pipeline_mode<synchronous>, transform_indices = @transform_2, window_bounds = array<i64: 8, 1>}, {pipeline_mode = #tpu.pipeline_mode<synchronous>, transform_indices = @transform_3, window_bounds = array<i64: 8, 1>}, {transform_indices = @transform_4, window_bounds = array<i64: 2, 8, 16>}]} {
    %c0_i32 = arith.constant 0 : i32
    %0 = arith.cmpi eq, %arg0, %c0_i32 : i32
    %c0_i32_0 = arith.constant 0 : i32
    %1 = arith.cmpi eq, %arg1, %c0_i32_0 : i32
    %2 = arith.andi %0, %1 : i1
    %3 = arith.extui %2 : i1 to i32
    %c0_i32_1 = arith.constant 0 : i32
    %4 = arith.cmpi ne, %3, %c0_i32_1 : i32
    scf.if %4 {
      %cst_43 = arith.constant 0.000000e+00 : f32
      %62 = vector.broadcast %cst_43 : f32 to vector<8x1xf32>
      %c0_44 = arith.constant 0 : index
      %c0_45 = arith.constant 0 : index
      %63 = vector.load %arg7[%c0_44, %c0_45] : memref<8x1xf32, #tpu.memory_space<vmem>>, vector<8x1xf32>
      tpu.vector_store %arg7[%c0_44, %c0_45], %62 {strides = array<i32>} : memref<8x1xf32, #tpu.memory_space<vmem>>, vector<8x1xf32>,
      %cst_46 = arith.constant 0.000000e+00 : f32
      %64 = vector.broadcast %cst_46 : f32 to vector<8x1xf32>
      %c0_47 = arith.constant 0 : index
      %c0_48 = arith.constant 0 : index
      %65 = vector.load %arg8[%c0_47, %c0_48] : memref<8x1xf32, #tpu.memory_space<vmem>>, vector<8x1xf32>
      tpu.vector_store %arg8[%c0_47, %c0_48], %64 {strides = array<i32>} : memref<8x1xf32, #tpu.memory_space<vmem>>, vector<8x1xf32>,
    } else {
    }
    %c0 = arith.constant 0 : index
    %c0_2 = arith.constant 0 : index
    %c0_3 = arith.constant 0 : index
    %5 = vector.load %arg2[%c0, %c0_2, %c0_3] : memref<2x4x16xf32, #tpu.memory_space<vmem>>, vector<1x4x16xf32>
    %6 = vector.shape_cast %5 : vector<1x4x16xf32> to vector<4x16xf32>
    %7 = tpu.iota {dimensions = array<i32: 1>} : vector<4x16xi32>
    %cst = arith.constant 0.000000e+00 : f32
    %8 = vector.broadcast %cst : f32 to vector<4x16xf32>
    %c0_i32_4 = arith.constant 0 : i32
    %9 = vector.broadcast %c0_i32_4 : i32 to vector<4x16xi32>
    %10 = arith.cmpi eq, %7, %9 : vector<4x16xi32>
    %c1_i32 = arith.constant 1 : i32
    %11 = tpu.dynamic_rotate %6 by %c1_i32 dim 1 : vector<4x16xf32>, i32 -> vector<4x16xf32>
    %12 = arith.select %10, %8, %11 : vector<4x16xi1>, vector<4x16xf32>
    %c15_i32 = arith.constant 15 : i32
    %13 = vector.broadcast %c15_i32 : i32 to vector<4x16xi32>
    %14 = arith.cmpi eq, %7, %13 : vector<4x16xi32>
    %c15_i32_5 = arith.constant 15 : i32
    %15 = tpu.dynamic_rotate %6 by %c15_i32_5 dim 1 : vector<4x16xf32>, i32 -> vector<4x16xf32>
    %16 = arith.select %14, %8, %15 : vector<4x16xi1>, vector<4x16xf32>
    %c0_6 = arith.constant 0 : index
    %c0_7 = arith.constant 0 : index
    %c0_8 = arith.constant 0 : index
    %17 = vector.load %arg3[%c0_6, %c0_7, %c0_8] : memref<3x8x4xf32, #tpu.memory_space<vmem>>, vector<1x8x4xf32>
    %18 = vector.shape_cast %17 : vector<1x8x4xf32> to vector<8x4xf32>
    %cst_9 = arith.constant dense<0.000000e+00> : vector<8x16xf32>
    %19 = tpu.matmul %18, %12, %cst_9 {dimension_numbers = #tpu.dot_dimension_numbers<[1], [0], [0], [1], [0, 0, 1, 1], [], []>} : vector<8x4xf32>, vector<4x16xf32>, vector<8x16xf32> -> vector<8x16xf32>
    %c1 = arith.constant 1 : index
    %c0_10 = arith.constant 0 : index
    %c0_11 = arith.constant 0 : index
    %20 = vector.load %arg3[%c1, %c0_10, %c0_11] : memref<3x8x4xf32, #tpu.memory_space<vmem>>, vector<1x8x4xf32>
    %21 = vector.shape_cast %20 : vector<1x8x4xf32> to vector<8x4xf32>
    %cst_12 = arith.constant dense<0.000000e+00> : vector<8x16xf32>
    %22 = tpu.matmul %21, %6, %cst_12 {dimension_numbers = #tpu.dot_dimension_numbers<[1], [0], [0], [1], [0, 0, 1, 1], [], []>} : vector<8x4xf32>, vector<4x16xf32>, vector<8x16xf32> -> vector<8x16xf32>
    %23 = arith.addf %19, %22 : vector<8x16xf32>
    %c2 = arith.constant 2 : index
    %c0_13 = arith.constant 0 : index
    %c0_14 = arith.constant 0 : index
    %24 = vector.load %arg3[%c2, %c0_13, %c0_14] : memref<3x8x4xf32, #tpu.memory_space<vmem>>, vector<1x8x4xf32>
    %25 = vector.shape_cast %24 : vector<1x8x4xf32> to vector<8x4xf32>
    %cst_15 = arith.constant dense<0.000000e+00> : vector<8x16xf32>
    %26 = tpu.matmul %25, %16, %cst_15 {dimension_numbers = #tpu.dot_dimension_numbers<[1], [0], [0], [1], [0, 0, 1, 1], [], []>} : vector<8x4xf32>, vector<4x16xf32>, vector<8x16xf32> -> vector<8x16xf32>
    %27 = arith.addf %23, %26 : vector<8x16xf32>
    %c1_16 = arith.constant 1 : index
    %c0_17 = arith.constant 0 : index
    %c0_18 = arith.constant 0 : index
    %28 = vector.load %arg2[%c1_16, %c0_17, %c0_18] : memref<2x4x16xf32, #tpu.memory_space<vmem>>, vector<1x4x16xf32>
    %29 = vector.shape_cast %28 : vector<1x4x16xf32> to vector<4x16xf32>
    %30 = tpu.iota {dimensions = array<i32: 1>} : vector<4x16xi32>
    %cst_19 = arith.constant 0.000000e+00 : f32
    %31 = vector.broadcast %cst_19 : f32 to vector<4x16xf32>
    %c0_i32_20 = arith.constant 0 : i32
    %32 = vector.broadcast %c0_i32_20 : i32 to vector<4x16xi32>
    %33 = arith.cmpi eq, %30, %32 : vector<4x16xi32>
    %c1_i32_21 = arith.constant 1 : i32
    %34 = tpu.dynamic_rotate %29 by %c1_i32_21 dim 1 : vector<4x16xf32>, i32 -> vector<4x16xf32>
    %35 = arith.select %33, %31, %34 : vector<4x16xi1>, vector<4x16xf32>
    %c15_i32_22 = arith.constant 15 : i32
    %36 = vector.broadcast %c15_i32_22 : i32 to vector<4x16xi32>
    %37 = arith.cmpi eq, %30, %36 : vector<4x16xi32>
    %c15_i32_23 = arith.constant 15 : i32
    %38 = tpu.dynamic_rotate %29 by %c15_i32_23 dim 1 : vector<4x16xf32>, i32 -> vector<4x16xf32>
    %39 = arith.select %37, %31, %38 : vector<4x16xi1>, vector<4x16xf32>
    %c0_24 = arith.constant 0 : index
    %c0_25 = arith.constant 0 : index
    %c0_26 = arith.constant 0 : index
    %40 = vector.load %arg3[%c0_24, %c0_25, %c0_26] : memref<3x8x4xf32, #tpu.memory_space<vmem>>, vector<1x8x4xf32>
    %41 = vector.shape_cast %40 : vector<1x8x4xf32> to vector<8x4xf32>
    %cst_27 = arith.constant dense<0.000000e+00> : vector<8x16xf32>
    %42 = tpu.matmul %41, %35, %cst_27 {dimension_numbers = #tpu.dot_dimension_numbers<[1], [0], [0], [1], [0, 0, 1, 1], [], []>} : vector<8x4xf32>, vector<4x16xf32>, vector<8x16xf32> -> vector<8x16xf32>
    %c1_28 = arith.constant 1 : index
    %c0_29 = arith.constant 0 : index
    %c0_30 = arith.constant 0 : index
    %43 = vector.load %arg3[%c1_28, %c0_29, %c0_30] : memref<3x8x4xf32, #tpu.memory_space<vmem>>, vector<1x8x4xf32>
    %44 = vector.shape_cast %43 : vector<1x8x4xf32> to vector<8x4xf32>
    %cst_31 = arith.constant dense<0.000000e+00> : vector<8x16xf32>
    %45 = tpu.matmul %44, %29, %cst_31 {dimension_numbers = #tpu.dot_dimension_numbers<[1], [0], [0], [1], [0, 0, 1, 1], [], []>} : vector<8x4xf32>, vector<4x16xf32>, vector<8x16xf32> -> vector<8x16xf32>
    %46 = arith.addf %42, %45 : vector<8x16xf32>
    %c2_32 = arith.constant 2 : index
    %c0_33 = arith.constant 0 : index
    %c0_34 = arith.constant 0 : index
    %47 = vector.load %arg3[%c2_32, %c0_33, %c0_34] : memref<3x8x4xf32, #tpu.memory_space<vmem>>, vector<1x8x4xf32>
    %48 = vector.shape_cast %47 : vector<1x8x4xf32> to vector<8x4xf32>
    %cst_35 = arith.constant dense<0.000000e+00> : vector<8x16xf32>
    %49 = tpu.matmul %48, %39, %cst_35 {dimension_numbers = #tpu.dot_dimension_numbers<[1], [0], [0], [1], [0, 0, 1, 1], [], []>} : vector<8x4xf32>, vector<4x16xf32>, vector<8x16xf32> -> vector<8x16xf32>
    %50 = arith.addf %46, %49 : vector<8x16xf32>
    %c0_i32_36 = arith.constant 0 : i32
    %51 = arith.cmpi eq, %arg0, %c0_i32_36 : i32
    %52 = arith.extui %51 : i1 to i32
    %c0_i32_37 = arith.constant 0 : i32
    %53 = arith.cmpi ne, %52, %c0_i32_37 : i32
    scf.if %53 {
      %cst_43 = arith.constant dense<0.000000e+00> : vector<8xf32>
      %62 = vector.multi_reduction <add>, %27, %cst_43 [1] : vector<8x16xf32> to vector<8xf32>
      %63 = vector.shape_cast %62 : vector<8xf32> to vector<8x1xf32>
      %cst_44 = arith.constant 0.000000e+00 : f32
      %64 = vector.broadcast %cst_44 : f32 to vector<8x1xf32>
      %65 = arith.addf %64, %63 : vector<8x1xf32>
      %cst_45 = arith.constant dense<0.000000e+00> : vector<8xf32>
      %66 = vector.multi_reduction <add>, %50, %cst_45 [1] : vector<8x16xf32> to vector<8xf32>
      %67 = vector.shape_cast %66 : vector<8xf32> to vector<8x1xf32>
      %68 = arith.addf %65, %67 : vector<8x1xf32>
      %69 = arith.mulf %27, %27 : vector<8x16xf32>
      %cst_46 = arith.constant dense<0.000000e+00> : vector<8xf32>
      %70 = vector.multi_reduction <add>, %69, %cst_46 [1] : vector<8x16xf32> to vector<8xf32>
      %71 = vector.shape_cast %70 : vector<8xf32> to vector<8x1xf32>
      %cst_47 = arith.constant 0.000000e+00 : f32
      %72 = vector.broadcast %cst_47 : f32 to vector<8x1xf32>
      %73 = arith.addf %72, %71 : vector<8x1xf32>
      %74 = arith.mulf %50, %50 : vector<8x16xf32>
      %cst_48 = arith.constant dense<0.000000e+00> : vector<8xf32>
      %75 = vector.multi_reduction <add>, %74, %cst_48 [1] : vector<8x16xf32> to vector<8xf32>
      %76 = vector.shape_cast %75 : vector<8xf32> to vector<8x1xf32>
      %77 = arith.addf %73, %76 : vector<8x1xf32>
      %c0_49 = arith.constant 0 : index
      %c0_50 = arith.constant 0 : index
      %78 = vector.load %arg7[%c0_49, %c0_50] : memref<8x1xf32, #tpu.memory_space<vmem>>, vector<8x1xf32>
      %79 = arith.addf %78, %68 : vector<8x1xf32>
      %c0_51 = arith.constant 0 : index
      %c0_52 = arith.constant 0 : index
      %80 = vector.load %arg7[%c0_51, %c0_52] : memref<8x1xf32, #tpu.memory_space<vmem>>, vector<8x1xf32>
      tpu.vector_store %arg7[%c0_51, %c0_52], %79 {strides = array<i32>} : memref<8x1xf32, #tpu.memory_space<vmem>>, vector<8x1xf32>,
      %c0_53 = arith.constant 0 : index
      %c0_54 = arith.constant 0 : index
      %81 = vector.load %arg8[%c0_53, %c0_54] : memref<8x1xf32, #tpu.memory_space<vmem>>, vector<8x1xf32>
      %82 = arith.addf %81, %77 : vector<8x1xf32>
      %c0_55 = arith.constant 0 : index
      %c0_56 = arith.constant 0 : index
      %83 = vector.load %arg8[%c0_55, %c0_56] : memref<8x1xf32, #tpu.memory_space<vmem>>, vector<8x1xf32>
      tpu.vector_store %arg8[%c0_55, %c0_56], %82 {strides = array<i32>} : memref<8x1xf32, #tpu.memory_space<vmem>>, vector<8x1xf32>,
    } else {
    }
    %c0_i32_38 = arith.constant 0 : i32
    %54 = arith.cmpi eq, %arg0, %c0_i32_38 : i32
    %c0_i32_39 = arith.constant 0 : i32
    %55 = arith.cmpi eq, %arg1, %c0_i32_39 : i32
    %56 = arith.andi %54, %55 : i1
    %57 = arith.extui %56 : i1 to i32
    %c0_i32_40 = arith.constant 0 : i32
    %58 = arith.cmpi ne, %57, %c0_i32_40 : i32
    scf.if %58 {
      %c0_43 = arith.constant 0 : index
      %c0_44 = arith.constant 0 : index
      %62 = vector.load %arg7[%c0_43, %c0_44] : memref<8x1xf32, #tpu.memory_space<vmem>>, vector<8x1xf32>
      %cst_45 = arith.constant 3.125000e-02 : f32
      %63 = vector.broadcast %cst_45 : f32 to vector<8x1xf32>
      %64 = arith.mulf %62, %63 : vector<8x1xf32>
      %c0_46 = arith.constant 0 : index
      %c0_47 = arith.constant 0 : index
      %65 = vector.load %arg8[%c0_46, %c0_47] : memref<8x1xf32, #tpu.memory_space<vmem>>, vector<8x1xf32>
      %cst_48 = arith.constant 3.125000e-02 : f32
      %66 = vector.broadcast %cst_48 : f32 to vector<8x1xf32>
      %67 = arith.mulf %65, %66 : vector<8x1xf32>
      %68 = arith.mulf %64, %64 : vector<8x1xf32>
      %69 = arith.subf %67, %68 : vector<8x1xf32>
      %cst_49 = arith.constant 0.000000e+00 : f32
      %70 = vector.broadcast %cst_49 : f32 to vector<8x1xf32>
      %71 = arith.maximumf %69, %70 : vector<8x1xf32>
      %c0_50 = arith.constant 0 : index
      %c0_51 = arith.constant 0 : index
      %72 = vector.load %arg4[%c0_50, %c0_51] : memref<8x1xf32, #tpu.memory_space<vmem>>, vector<8x1xf32>
      %cst_52 = arith.constant 9.99999974E-6 : f32
      %73 = vector.broadcast %cst_52 : f32 to vector<8x1xf32>
      %74 = arith.addf %71, %73 : vector<8x1xf32>
      %75 = math.rsqrt %74 : vector<8x1xf32>
      %76 = arith.mulf %72, %75 : vector<8x1xf32>
      %c0_53 = arith.constant 0 : index
      %c0_54 = arith.constant 0 : index
      %77 = vector.load %arg9[%c0_53, %c0_54] : memref<8x1xf32, #tpu.memory_space<vmem>>, vector<8x1xf32>
      tpu.vector_store %arg9[%c0_53, %c0_54], %76 {strides = array<i32>} : memref<8x1xf32, #tpu.memory_space<vmem>>, vector<8x1xf32>,
      %c0_55 = arith.constant 0 : index
      %c0_56 = arith.constant 0 : index
      %78 = vector.load %arg5[%c0_55, %c0_56] : memref<8x1xf32, #tpu.memory_space<vmem>>, vector<8x1xf32>
      %79 = arith.mulf %64, %76 : vector<8x1xf32>
      %80 = arith.subf %78, %79 : vector<8x1xf32>
      %c0_57 = arith.constant 0 : index
      %c0_58 = arith.constant 0 : index
      %81 = vector.load %arg10[%c0_57, %c0_58] : memref<8x1xf32, #tpu.memory_space<vmem>>, vector<8x1xf32>
      tpu.vector_store %arg10[%c0_57, %c0_58], %80 {strides = array<i32>} : memref<8x1xf32, #tpu.memory_space<vmem>>, vector<8x1xf32>,
    } else {
    }
    %c1_i32_41 = arith.constant 1 : i32
    %59 = arith.cmpi eq, %arg0, %c1_i32_41 : i32
    %60 = arith.extui %59 : i1 to i32
    %c0_i32_42 = arith.constant 0 : i32
    %61 = arith.cmpi ne, %60, %c0_i32_42 : i32
    scf.if %61 {
      %c0_43 = arith.constant 0 : index
      %c0_44 = arith.constant 0 : index
      %62 = vector.load %arg9[%c0_43, %c0_44] : memref<8x1xf32, #tpu.memory_space<vmem>>, vector<8x1xf32>
      %c0_45 = arith.constant 0 : index
      %c0_46 = arith.constant 0 : index
      %63 = vector.load %arg10[%c0_45, %c0_46] : memref<8x1xf32, #tpu.memory_space<vmem>>, vector<8x1xf32>
      %64 = vector.broadcast %62 : vector<8x1xf32> to vector<8x16xf32>
      %65 = arith.mulf %27, %64 : vector<8x16xf32>
      %66 = vector.broadcast %63 : vector<8x1xf32> to vector<8x16xf32>
      %67 = arith.addf %65, %66 : vector<8x16xf32>
      %cst_47 = arith.constant 0.000000e+00 : f32
      %68 = vector.broadcast %cst_47 : f32 to vector<8x16xf32>
      %69 = arith.maximumf %67, %68 : vector<8x16xf32>
      %c0_48 = arith.constant 0 : index
      %c0_49 = arith.constant 0 : index
      %c0_50 = arith.constant 0 : index
      %70 = vector.load %arg6[%c0_48, %c0_49, %c0_50] : memref<2x8x16xf32, #tpu.memory_space<vmem>>, vector<1x8x16xf32>
      %71 = vector.shape_cast %70 : vector<1x8x16xf32> to vector<8x16xf32>
      %72 = vector.shape_cast %69 : vector<8x16xf32> to vector<1x8x16xf32>
      tpu.vector_store %arg6[%c0_48, %c0_49, %c0_50], %72 {strides = array<i32>} : memref<2x8x16xf32, #tpu.memory_space<vmem>>, vector<1x8x16xf32>,
      %73 = vector.broadcast %62 : vector<8x1xf32> to vector<8x16xf32>
      %74 = arith.mulf %50, %73 : vector<8x16xf32>
      %75 = vector.broadcast %63 : vector<8x1xf32> to vector<8x16xf32>
      %76 = arith.addf %74, %75 : vector<8x16xf32>
      %cst_51 = arith.constant 0.000000e+00 : f32
      %77 = vector.broadcast %cst_51 : f32 to vector<8x16xf32>
      %78 = arith.maximumf %76, %77 : vector<8x16xf32>
      %c1_52 = arith.constant 1 : index
      %c0_53 = arith.constant 0 : index
      %c0_54 = arith.constant 0 : index
      %79 = vector.load %arg6[%c1_52, %c0_53, %c0_54] : memref<2x8x16xf32, #tpu.memory_space<vmem>>, vector<1x8x16xf32>
      %80 = vector.shape_cast %79 : vector<1x8x16xf32> to vector<8x16xf32>
      %81 = vector.shape_cast %78 : vector<8x16xf32> to vector<1x8x16xf32>
      tpu.vector_store %arg6[%c1_52, %c0_53, %c0_54], %81 {strides = array<i32>} : memref<2x8x16xf32, #tpu.memory_space<vmem>>, vector<1x8x16xf32>,
    } else {
    }
    return
  }
  func.func @transform_0(%arg0: i32, %arg1: i32) -> (i32, i32, i32) {
    %c0_i32 = arith.constant 0 : i32
    %c0_i32_0 = arith.constant 0 : i32
    %c0_i32_1 = arith.constant 0 : i32
    return %arg1, %c0_i32, %c0_i32_0 : i32, i32, i32
  }
  func.func @transform_1(%arg0: i32, %arg1: i32) -> (i32, i32, i32) {
    %c0_i32 = arith.constant 0 : i32
    %c0_i32_0 = arith.constant 0 : i32
    %c0_i32_1 = arith.constant 0 : i32
    %c0_i32_2 = arith.constant 0 : i32
    return %c0_i32, %c0_i32_0, %c0_i32_1 : i32, i32, i32
  }
  func.func @transform_2(%arg0: i32, %arg1: i32) -> (i32, i32) {
    %c0_i32 = arith.constant 0 : i32
    %c0_i32_0 = arith.constant 0 : i32
    %c0_i32_1 = arith.constant 0 : i32
    return %c0_i32, %c0_i32_0 : i32, i32
  }
  func.func @transform_3(%arg0: i32, %arg1: i32) -> (i32, i32) {
    %c0_i32 = arith.constant 0 : i32
    %c0_i32_0 = arith.constant 0 : i32
    %c0_i32_1 = arith.constant 0 : i32
    return %c0_i32, %c0_i32_0 : i32, i32
  }
  func.func @transform_4(%arg0: i32, %arg1: i32) -> (i32, i32, i32) {
    %0 = arith.muli %arg1, %arg0 : i32
    %c0_i32 = arith.constant 0 : i32
    %c0_i32_0 = arith.constant 0 : i32
    %c0_i32_1 = arith.constant 0 : i32
    return %0, %c0_i32, %c0_i32_0 : i32, i32, i32
  }
}

</mosaic_0001>

<bundles_post_ra>
// kernel: conv_unit.1
= control target key start
LH: loop header
LB: loop body
LE: loop exit
PB: predicated region body
PF: predicated region fallthrough
CT: control target
= control target key end

     0   :  { %9 = vsyncpa [#allocation7], 0  ;;  %s1556_s0 = inlined_call_operand.hbm [shape: f32[2,4,16], index: 0, kind: input, shape index: {}]   ;;  %s1557_s1 = inlined_call_operand.hbm [shape: f32[3,8,4], index: 1, kind: input, shape index: {}]   ;;  %s1558_s2 = inlined_call_operand.hbm [shape: f32[8,1], index: 2, kind: input, shape index: {}]   ;;  %s1559_s3 = inlined_call_operand.hbm [shape: f32[8,1], index: 3, kind: input, shape index: {}]   ;;  %s1560_s4 = inlined_call_operand.hbm [shape: f32[2,8,16], index: 4, kind: output, shape index: {}]  }
   0x1   :  { %10 = vsyncpa [#allocation10], 0 }
   0x2   :  { %11 = vsyncpa [#allocation13], 0 }
   0x3   :  { %12 = vsyncpa [#allocation8], 0 }
   0x4   :  { %14 = vsyncpa [#allocation8 + $0x1], 0  ;;  %s1346_s15 = smov 0   ;;  %s1348_s16 = smov 0  }
   0x5   :  { %s1350_s17 = smov 0  }
   0x6 LB: > { %s1303_s18 = smov [#allocation9]   ;;  %s949_s20 = sadd.s32 4294967295, %s1301_s17   ;;  %s1301_s17 = sphi %s1350_s17, %s20_s17   ;;  %s1297_s16 = sphi %s1348_s16, %s1574_s16   ;;  %s1293_s15 = sphi %s1346_s15, %s1573_s15  }
   0x7   : > { %s182_s19 = sshll.u32 %s1303_s18, 4  ;;  %s950_s21 = sadd.s32 4294967294, %s1301_s17   ;;  %s183_s19 = int_to_ptr.vmem [resolvable:$true] %s182_s19 }
   0x8   : > { %p951_p0 = scmp.ge.s32.totalorder %s1301_s17, 1  ;;  %p154_p1 = scmp.lt.s32.totalorder %s1301_s17, 3 }
   0x9   : > { %p1367_p2 = scmp.eq.s32.totalorder %s949_s20, 0  ;;  %s32_s25 = sadd.s32 1, %s1297_s16 }
   0xa   : > { %p1371_p3 = pnand %p951_p0, %p154_p1  ;;  %p1384_p6 = scmp.ge.s32.totalorder %s32_s25, 2 }
   0xb   : > { %s1564_s22 = scalar_select %p1367_p2, 1, 0 }
   0xc   : > { %s1565_s23 = scalar_select %p1371_p3, 1, 0 }
   0xd   : > { %p1052_p4 = pneg %p1371_p3  ;;  %s1125_s29 = scalar_lea.hbm %s1557_s1, 384 }
   0xe   : > { %s1567_s26 = scalar_select %p1384_p6, 1, 0 }
   0xf   : > { %p1379_p5 = pnand %p1367_p2, %p1052_p4  ;;  %p1126_p7 = scmp.ne.s32.totalorder %s1557_s1, %s1125_s29 }
  0x10   : > { %p1132_p11 = scmp.lt.u32.totalorder %s1125_s29, %s1557_s1 }
  0x11   : > { %p1396_p8 = pneg %p1379_p5 }
  0x13   : > { %p1128_p9 = pnand %p1396_p8, %p1126_p7 }
  0x15   : > { %p1129_p10 = pneg %p1128_p9 }
  0x17   : > { %p1134_p12 = pnand %p1132_p11, %p1129_p10 }
  0x19   : > { %1137 = shalt.err (!%p1134_p12)
}
  0x1a   : > { %s1138_s9 = scalar_lea.vmem %s183_s19, 384  ;;  %p1146_p4 = scmp.lt.s32.totalorder %s183_s19, %s183_s19 }
  0x1b   : > { %p1139_p13 = scmp.ne.s32.totalorder %s183_s19, %s1138_s9  ;;  %p1147_p2 = scmp.lt.s32.totalorder %s1138_s9, %s1138_s9 }
  0x1d   : > { %p1141_p0 = pnand %p1139_p13, %p1396_p8  ;;  %p1148_p3 = por %p1147_p2, %p1146_p4 }
  0x1f   : > { %p1142_p1 = pneg %p1141_p0 }
  0x21   : > { %p1149_p6 = pnand %p1148_p3, %p1142_p1 }
  0x23   : > { %1152 = shalt.err (!%p1149_p6)
}
  0x24   : > { %s1304_s10 = smov 128   ;;  %s1305_s11 = smov 8  }
  0x25   : > { %1058 = dma.hbm_to_vmem [thread:$0]  (!%p1379_p5), %s1557_s1, 384, %s183_s19, [#allocation10], %s1304_s10, %s1304_s10, %s1305_s11  }
  0x26   : > { %p1569_p7 = scmp.ne.s32.totalorder %s1567_s26, 0  ;;  %s1306_s14 = smov [#allocation6]  }
  0x27   : > { %s169_s18 = sshll.u32 %s1306_s14, 4  ;;  %s1153_s29 = scalar_lea.hbm %s1556_s0, 128  ;;  %s170_s18 = int_to_ptr.vmem [resolvable:$true] %s169_s18 }
  0x28   : > { %s1576_s25 = smov (%p1569_p7, %s32_s25), 0  ;;  %p1154_p2 = scmp.ne.s32.totalorder %s1556_s0, %s1153_s29 }
  0x29   : > { %p1160_p9 = scmp.lt.u32.totalorder %s1153_s29, %s1556_s0 }
  0x2a   : > { %p1156_p3 = pnand %p1154_p2, %p1396_p8 }
  0x2c   : > { %p1157_p6 = pneg %p1156_p3 }
  0x2e   : > { %p1162_p10 = pnand %p1160_p9, %p1157_p6 }
  0x30   : > { %1165 = shalt.err (!%p1162_p10)
}
  0x31   : > { %s1166_s19 = scalar_lea.vmem %s170_s18, 128  ;;  %p1174_p0 = scmp.lt.s32.totalorder %s170_s18, %s170_s18 }
  0x32   : > { %p1167_p11 = scmp.ne.s32.totalorder %s170_s18, %s1166_s19  ;;  %p1175_p1 = scmp.lt.s32.totalorder %s1166_s19, %s1166_s19 }
  0x34   : > { %p1169_p12 = pnand %p1167_p11, %p1396_p8  ;;  %p1176_p4 = por %p1175_p1, %p1174_p0 }
  0x36   : > { %p1170_p13 = pneg %p1169_p12 }
  0x38   : > { %p1177_p7 = pnand %p1176_p4, %p1170_p13 }
  0x3a   : > { %1180 = shalt.err (!%p1177_p7)
}
  0x3b   : > { %s1307_s26 = smov 64   ;;  %s1308_s9 = smov 4  }
  0x3c   : > { %1055 = dma.hbm_to_vmem [thread:$0]  (!%p1379_p5), %s1556_s0, 128, %s170_s18, [#allocation7], %s1307_s26, %s1307_s26, %s1308_s9  }
  0x3d   : > { %s1309_s12 = smov [#allocation11]   ;;  %s1310_s14 = smov [#allocation12]  }
  0x3e   : > { %s196_s13 = sshll.u32 %s1309_s12, 4  ;;  %s207_s27 = sshll.u32 %s1310_s14, 4  ;;  %s197_s13 = int_to_ptr.vmem [resolvable:$true] %s196_s13  ;;  %s1434_s27 = int_to_ptr.vmem [resolvable:$true] %s207_s27 }
  0x3f   : > { %s1181_s30 = scalar_lea.hbm %s1558_s2, 128 }
  0x40   : > { %p1182_p2 = scmp.ne.s32.totalorder %s1558_s2, %s1181_s30  ;;  %p1188_p9 = scmp.lt.u32.totalorder %s1181_s30, %s1558_s2 }
  0x42   : > { %p1184_p3 = pnand %p1182_p2, %p1396_p8 }
  0x44   : > { %p1185_p6 = pneg %p1184_p3 }
  0x46   : > { %p1190_p10 = pnand %p1188_p9, %p1185_p6 }
  0x48   : > { %1193 = shalt.err (!%p1190_p10)
}
  0x49   : > { %s1194_s19 = scalar_lea.vmem %s197_s13, 128  ;;  %p1202_p0 = scmp.lt.s32.totalorder %s197_s13, %s197_s13 }
  0x4a   : > { %p1195_p11 = scmp.ne.s32.totalorder %s197_s13, %s1194_s19  ;;  %p1203_p1 = scmp.lt.s32.totalorder %s1194_s19, %s1194_s19 }
  0x4c   : > { %p1197_p12 = pnand %p1195_p11, %p1396_p8  ;;  %p1204_p4 = por %p1203_p1, %p1202_p0 }
  0x4e   : > { %p1198_p13 = pneg %p1197_p12 }
  0x50   : > { %p1205_p7 = pnand %p1204_p4, %p1198_p13 }
  0x52   : > { %1208 = shalt.err (!%p1205_p7)
}
  0x53   : > { %1061 = dma.hbm_to_vmem [thread:$0]  (!%p1379_p5), %s1558_s2, 128, %s197_s13, [#allocation10]  }
  0x54   : > { %s1209_s12 = scalar_lea.hbm %s1559_s3, 128 }
  0x55   : > { %p1210_p2 = scmp.ne.s32.totalorder %s1559_s3, %s1209_s12  ;;  %p1216_p9 = scmp.lt.u32.totalorder %s1209_s12, %s1559_s3 }
  0x57   : > { %p1212_p3 = pnand %p1210_p2, %p1396_p8 }
  0x59   : > { %p1213_p6 = pneg %p1212_p3 }
  0x5b   : > { %p1218_p10 = pnand %p1216_p9, %p1213_p6 }
  0x5d   : > { %1221 = shalt.err (!%p1218_p10)
}
  0x5e   : > { %s1222_s13 = scalar_lea.vmem %s1434_s27, 128  ;;  %p1230_p0 = scmp.lt.s32.totalorder %s1434_s27, %s1434_s27 }
  0x5f   : > { %p1223_p11 = scmp.ne.s32.totalorder %s1434_s27, %s1222_s13  ;;  %p1231_p1 = scmp.lt.s32.totalorder %s1222_s13, %s1222_s13 }
  0x61   : > { %p1225_p12 = pnand %p1223_p11, %p1396_p8  ;;  %p1232_p4 = por %p1231_p1, %p1230_p0 }
  0x63   : > { %p1226_p13 = pneg %p1225_p12 }
  0x65   : > { %p1233_p7 = pnand %p1232_p4, %p1226_p13 }
  0x67   : > { %1236 = shalt.err (!%p1233_p7)
}
  0x68   : > { %1064 = dma.hbm_to_vmem [thread:$0]  (!%p1379_p5), %s1559_s3, 128, %s1434_s27, [#allocation13]  }
  0x69   : > { %p1570_p2 = scmp.ne.s32.totalorder %s1565_s23, 0 }
  0x6a   : > { %p1571_p3 = scmp.ne.s32.totalorder (!%p1570_p2), %s1564_s22, 0 }
  0x6b   : > { %220 = sbr.rel (%p1570_p2) target bundleno = 1049 (0x419), region = 36 }
  0x72   : > { %1276 = dma.done.wait (%p1571_p3), [#allocation7], 128  }
  0x73   : > { %1278 = vsyncadd (%p1571_p3), [#allocation7], 4294967168 }
  0x74   : > { %1280 = dma.done.wait (%p1571_p3), [#allocation10], 512  }
  0x75   : > { %1282 = vsyncadd (%p1571_p3), [#allocation10], 4294966784 }
  0x76   : > { %1284 = dma.done.wait (%p1571_p3), [#allocation13], 128  }
  0x77   : > { %1286 = vsyncadd (%p1571_p3), [#allocation13], 4294967168  ;;  %p256_p5 = scmp.eq.s32.totalorder %s1293_s15, 0 }
  0x78   : > { %vm262_vm0 = vcmask (%p256_p5), 7168   ;;  %v1311_v0 = vmov (%p256_p5), 0.0  }
  0x79   : > { %261 = sbr.rel (!%p256_p5) target bundleno = 128 (0x80), region = 56  ;;  %263 = vst.msk [vmem:[#allocation2] sm:$0xff] (%p256_p5), %vm262_vm0, %v1311_v0  ;;  %264 = vst.msk [vmem:[#allocation3] sm:$0xff] (%p256_p5), %vm262_vm0, %v1311_v0 }
  0x80 PF: > { %v265_v1 = vld [vmem:[#allocation6] sm:$0xf]  ;;  %s1312_s23 = smov 16   ;;  %v523_v2 = vld [vmem:[#allocation6 + $0x4] sm:$0xf]  ;;  %vm269_vm1 = vcmask 1047680   ;;  %v266_v13 = vlaneseq }
  0x81   : > { %270 = vrot.lane.b32.xlu0 %v265_v1, %s1312_s23  ;;  %vm293_vm2 = vcmask 1043456   ;;  %v288_v3 = vld [vmem:[#allocation9 + $0x8] sm:$0xff]  ;;  %vm289_vm3 = vcmask 31744   ;;  %v1313_v4 = vmov 0.0   ;;  %vm1314_vm4 = vmmov 0   ;;  %s1315_s22 = smov 113  }
  0x82   : > { %994 = vmatprep.subr.mxu0 %v1313_v4  ;;  %996 = vmatprep.mubr.msk.f32.mxu0 %vm1314_vm4, %v1313_v4  ;;  %s1316_s24 = smov 127   ;;  %v267_v14 = vand.u32 127, %v266_v13  ;;  %v286_v16 = vld [vmem:[#allocation9] sm:$0xff]  ;;  %v444_v23 = vld [vmem:[#allocation9 + $0x10] sm:$0xff]  ;;  %p974_p8 = scmp.ne.s32.totalorder %s1293_s15, 0 }
  0x83   : > { %995 = vmatpush3.msk.msra.mxu0 %vm293_vm2, %v265_v1  ;;  %1009 = vmatprep.subr.mxu1 %v1313_v4  ;;  %vm762_vm7 = vcmask (!%p974_p8), 130048   ;;  %v781_v37 = vld [vmem:[#allocation2] sm:$0xff] (!%p974_p8)  ;;  %v785_v40 = vld [vmem:[#allocation3] sm:$0xff] (!%p974_p8)  ;;  %vm783_vm8 = vcmask (!%p974_p8), 7168  }
  0x84   : > { %997 = vmatmul.mubr.msk.f32.vlgmr.msra.gmra.mrb[0].mxu0 %vm289_vm3, %v288_v3  ;;  %1010 = vmatpush3.msk.msra.mxu1 %vm293_vm2, %v523_v2  ;;  %vm268_vm5 = vcmp.eq.s32.totalorder %v267_v14, 0  ;;  %vm281_vm6 = vcmp.eq.s32.totalorder %v267_v14, 15 }
  0x85   : > { %524 = vrot.lane.b32.xlu0 %v523_v2, %s1312_s23  ;;  %1011 = vmatprep.mubr.msk.f32.mxu1 %vm1314_vm4, %v1313_v4 }
  0x86   : > { %1012 = vmatmul.mubr.msk.f32.vlgmr.msra.gmra.mrb[0].mxu1 %vm289_vm3, %v288_v3  ;;  %999 = vmatprep.subr.mxu0 %v1313_v4 }
  0x87   : > { %1001 = vmatprep.mubr.msk.f32.mxu0 %vm1314_vm4, %v1313_v4  ;;  %1014 = vmatprep.subr.mxu1 %v1313_v4 }
  0x88   : > { %1016 = vmatprep.mubr.msk.f32.mxu1 %vm1314_vm4, %v1313_v4 }
  0xf3   : > { %v271_v5 = vpop.permute.xlu0 %270 }
  0xf4   : > { %v272_v6 = vsel %vm269_vm1, %v271_v5, %v265_v1 }
  0xf5   : > { %273 = vrot.lane.b32.xlu1 %v272_v6, %s1312_s23 }
  0xf7   : > { %v525_v7 = vpop.permute.xlu0 %524 }
  0xf8   : > { %v526_v8 = vsel %vm269_vm1, %v525_v7, %v523_v2 }
  0xf9   : > { %527 = vrot.lane.b32.xlu1 %v526_v8, %s1312_s23 }
 0x167   : > { %v274_v9 = vpop.permute.xlu1 %273 }
 0x168   : > { %v275_v10 = vsel %vm269_vm1, %v274_v9, %v265_v1 }
 0x169   : > { %277 = vrot.lane.b32.xlu0 %v275_v10, %s1315_s22 }
 0x16b   : > { %v528_v11 = vpop.permute.xlu1 %527 }
 0x16c   : > { %v529_v12 = vsel %vm269_vm1, %v528_v11, %v523_v2 }
 0x16d   : > { %282 = vrot.lane.b32.xlu0 %v275_v10, %s1316_s24  ;;  %531 = vrot.lane.b32.xlu1 %v529_v12, %s1315_s22 }
 0x171   : > { %535 = vrot.lane.b32.xlu1 %v529_v12, %s1316_s24 }
 0x1db   : > { %v278_v15 = vpop.permute.xlu0 %277 }
 0x1dc   : > { %v280_v17 = vsel %vm268_vm5, 0.0, %v278_v15 }
 0x1dd   : > { %1000 = vmatpush3.msk.msra.mxu0 %vm293_vm2, %v280_v17 }
 0x1de   : > { %1002 = vmatmul.mubr.msk.f32.vlgmr.msra.gmra.mrb[0].mxu0 %vm289_vm3, %v286_v16  ;;  %1004 = vmatprep.subr.mxu0 %v1313_v4 }
 0x1df   : > { %v532_v18 = vpop.permute.xlu1 %531  ;;  %v283_v19 = vpop.permute.xlu0 %282  ;;  %1006 = vmatprep.mubr.msk.f32.mxu0 %vm1314_vm4, %v1313_v4 }
 0x1e0   : > { %v534_v20 = vsel %vm268_vm5, 0.0, %v532_v18  ;;  %v285_v21 = vsel %vm281_vm6, 0.0, %v283_v19 }
 0x1e1   : > { %1005 = vmatpush3.msk.msra.mxu0 %vm293_vm2, %v285_v21  ;;  %1015 = vmatpush3.msk.msra.mxu1 %vm293_vm2, %v534_v20 }
 0x1e2   : > { %1017 = vmatmul.mubr.msk.f32.vlgmr.msra.gmra.mrb[0].mxu1 %vm289_vm3, %v286_v16  ;;  %1019 = vmatprep.subr.mxu1 %v1313_v4 }
 0x1e3   : > { %v536_v22 = vpop.permute.xlu1 %535  ;;  %1021 = vmatprep.mubr.msk.f32.mxu1 %vm1314_vm4, %v1313_v4 }
 0x1e4   : > { %v538_v24 = vsel %vm281_vm6, 0.0, %v536_v22 }
 0x1e5   : > { %1020 = vmatpush3.msk.msra.mxu1 %vm293_vm2, %v538_v24 }
 0x1e6   : > { %1007 = vmatmul.mubr.msk.f32.vlgmr.msra.gmra.mrb[0].mxu0 %vm289_vm3, %v444_v23 }
 0x1ea   : > { %1022 = vmatmul.mubr.msk.f32.vlgmr.msra.gmra.mrb[0].mxu1 %vm289_vm3, %v444_v23 }
 0x2b8   : > { %761 = sbr.rel (%p974_p8) target bundleno = 852 (0x354), region = 60 }
 0x2b9   : > { %v517_v25 = vpop.f32.mrb[0].mxu0 }
 0x2ba   : > { %v1008_v26 = vpop.f32.mrb[1].mxu0  ;;  %v771_v29 = vmul.f32 (!%p974_p8), %v517_v25, %v517_v25  ;;  %v763_v31 = vsel (!%p974_p8), %vm762_vm7, %v517_v25, 0.0 }
 0x2bb   : > { %764 = vadd.xlane.f32.xlu0 (!%p974_p8), %v763_v31 }
 0x2bc   : > { %v772_v32 = vsel (!%p974_p8), %vm762_vm7, %v771_v29, 0.0 }
 0x2bd   : > { %v754_v27 = vpop.f32.mrb[0].mxu1  ;;  %773 = vadd.xlane.f32.xlu1 (!%p974_p8), %v772_v32 }
 0x2be   : > { %v1023_v28 = vpop.f32.mrb[1].mxu1  ;;  %v776_v30 = vmul.f32 (!%p974_p8), %v754_v27, %v754_v27  ;;  %v767_v33 = vsel (!%p974_p8), %vm762_vm7, %v754_v27, 0.0 }
 0x2bf   : > { %768 = vadd.xlane.f32.xlu0 %v767_v33 }
 0x2c0   : > { %v777_v34 = vsel %vm762_vm7, %v776_v30, 0.0 }
 0x2c1   : > { %778 = vadd.xlane.f32.xlu1 %v777_v34 }
 0x348   : > { %v765_v35 = vpop.xlane.xlu0 %764 }
 0x34a   : > { %v774_v36 = vpop.xlane.xlu1 %773 }
 0x34c   : > { %v769_v38 = vpop.xlane.xlu0 %768 }
 0x34d   : > { %v770_v39 = vadd.f32 %v769_v38, %v765_v35 }
 0x34e   : > { %v779_v41 = vpop.xlane.xlu1 %778 }
 0x34f   : > { %v780_v42 = vadd.f32 %v779_v41, %v774_v36  ;;  %v782_v43 = vadd.f32 %v781_v37, %v770_v39 }
 0x351   : > { %v786_v44 = vadd.f32 %v785_v40, %v780_v42  ;;  %784 = vst.msk [vmem:[#allocation2] sm:$0xff] %vm783_vm8, %v782_v43 }
 0x353   : > { %787 = vst.msk [vmem:[#allocation3] sm:$0xff] %vm783_vm8, %v786_v44 }
 0x354 PF: > { %789 = sbr.rel (!%p256_p5) target bundleno = 885 (0x375), region = 64  ;;  %v797_v53 = vld [vmem:[#allocation11] sm:$0xff] (%p256_p5)  ;;  %vm801_vm9 = vcmask (%p256_p5), 7168   ;;  %v803_v56 = vld [vmem:[#allocation12] sm:$0xff] (%p256_p5) }
 0x358   : > { %v790_v45 = vld [vmem:[#allocation2] sm:$0xff] (%p256_p5) }
 0x359   : > { %v791_v47 = vmul.f32 (%p256_p5), 0.03125, %v790_v45 }
 0x35a   : > { %v792_v46 = vld [vmem:[#allocation3] sm:$0xff] (%p256_p5) }
 0x35b   : > { %v793_v48 = vmul.f32 0.03125, %v792_v46  ;;  %v794_v49 = vmul.f32 %v791_v47, %v791_v47 }
 0x35d   : > { %v795_v50 = vsub.f32 %v793_v48, %v794_v49 }
 0x35f   : > { %v796_v51 = vmax.f32 %v795_v50, 0.0 }
 0x361   : > { %v798_v52 = vadd.f32 1e-05, %v796_v51 }
 0x363   : > { %1122 = vrsqrt.f32 %v798_v52 }
 0x36d   : > { %v1123_v54 = vpop.eup %1122 }
 0x36e   : > { %v800_v55 = vmul.f32 %v1123_v54, %v797_v53 }
 0x370   : > { %802 = vst.msk [vmem:[#allocation4] sm:$0xff] %vm801_vm9, %v800_v55  ;;  %v804_v57 = vmul.f32 %v800_v55, %v791_v47 }
 0x372   : > { %v805_v58 = vsub.f32 %v803_v56, %v804_v57 }
 0x374   : > { %806 = vst.msk [vmem:[#allocation5] sm:$0xff] %vm801_vm9, %v805_v58 }
 0x375 PF: > { %p975_p6 = scmp.ne.s32.totalorder %s1293_s15, 1 }
 0x376   : > { %v1317_v60 = vmov (!%p975_p6), 0   ;;  %vm826_vm10 = vcmask (!%p975_p6), 130048  }
 0x377   : > { %810 = sbr.rel (%p975_p6) target bundleno = 1025 (0x401), region = 68  ;;  %v811_v59 = vld [vmem:[#allocation4] sm:$0xff] (!%p975_p6)  ;;  %1124 = vset.pattern.permute.xlu0 (!%p975_p6), %v1317_v60 }
 0x378   : > { %815 = vperm.xlu0 (!%p975_p6), %1124, %v811_v59  }
 0x37b   : > { %v812_v61 = vld [vmem:[#allocation5] sm:$0xff] (!%p975_p6) }
 0x37c   : > { %821 = vperm.xlu0 (!%p975_p6), %1124, %v812_v61  }
 0x3f7   : > { %v816_v62 = vpop.permute.xlu0 %815 }
 0x3f8   : > { %v818_v63 = vmul.f32 %v816_v62, %v517_v25  ;;  %v828_v0 = vmul.f32 %v816_v62, %v754_v27 }
 0x3fb   : > { %v822_v1 = vpop.permute.xlu0 %821 }
 0x3fc   : > { %v824_v2 = vadd.f32 %v822_v1, %v818_v63  ;;  %v829_v3 = vadd.f32 %v828_v0, %v822_v1 }
 0x3fe   : > { %v825_v4 = vmax.f32 %v824_v2, 0.0  ;;  %v830_v5 = vmax.f32 %v829_v3, 0.0 }
 0x400   : > { %827 = vst.msk [vmem:[#allocation14] sm:$0xff] %vm826_vm10, %v825_v4  ;;  %976 = vst.msk [vmem:[#allocation14 + $0x8] sm:$0xff] %vm826_vm10, %v830_v5 }
 0x401 PF: > { %p1522_p9 = scmp.eq.s32.totalorder %s949_s20, 1  ;;  %s1318_s6 = smov [#allocation14]  }
 0x402   : > { %s848_s27 = sshll.u32 %s1318_s6, 4  ;;  %s849_s27 = int_to_ptr.vmem [resolvable:$true] %s848_s27 }
 0x403   : > { %s1237_s8 = scalar_lea.vmem %s849_s27, 256  ;;  %s1243_s18 = scalar_lea.vmem %s849_s27, 512 }
 0x404   : > { %p1238_p10 = scmp.ne.s32.totalorder %s849_s27, %s1237_s8  ;;  %p1244_p13 = scmp.lt.s32.totalorder %s849_s27, %s849_s27 }
 0x405   : > { %p1245_p0 = scmp.lt.s32.totalorder %s1243_s18, %s1237_s8 }
 0x406   : > { %p1239_p11 = pnand %p1238_p10, %p1522_p9 }
 0x407   : > { %p1246_p1 = por %p1245_p0, %p1244_p13 }
 0x408   : > { %p1240_p12 = pneg %p1239_p11 }
 0x40a   : > { %p1247_p4 = pnand %p1246_p1, %p1240_p12 }
 0x40c   : > { %1250 = shalt.err (!%p1247_p4)
}
 0x40d   : > { %s1251_s26 = scalar_lea.hbm %s1560_s4, 256 }
 0x40e   : > { %p1252_p7 = scmp.ne.s32.totalorder %s1560_s4, %s1251_s26  ;;  %p1257_p5 = scmp.lt.u32.totalorder %s1251_s26, %s1560_s4 }
 0x410   : > { %p1253_p2 = pnand %p1252_p7, %p1522_p9 }
 0x412   : > { %p1254_p3 = pneg %p1253_p2 }
 0x414   : > { %p1259_p8 = pnand %p1257_p5, %p1254_p3 }
 0x416   : > { %1262 = shalt.err (!%p1259_p8)
}
 0x417   : > { %s1319_s14 = smov 128   ;;  %s1320_s28 = smov 8  }
 0x418   : > { %1049 = dma.vmem_to_hbm [thread:$0]  (%p1522_p9), %s849_s27, 256, %s1560_s4, [#allocation8], %s1319_s14, %s1319_s14, %s1320_s28  }
 0x419 PF: > { %p1078_p6 = scmp.ge.s32.totalorder %s1301_s17, 2  ;;  %p1079_p10 = scmp.eq.s32.totalorder %s950_s21, 1 }
 0x41b   : > { %p1066_p11 = pnand %p1079_p10, %p1078_p6 }
 0x41d   : > { %1288 = dma.done.wait (!%p1066_p11), [#allocation8], 256  }
 0x41e   : > { %1290 = vsyncadd (!%p1066_p11), [#allocation8], 4294967040  ;;  %s20_s17 = sadd.s32 1, %s1301_s17   ;;  %s1573_s15 = smov %s1297_s16 }
 0x41f   : > { %p17_p12 = scmp.ge.s32.totalorder %s20_s17, 4   ;;  %s1574_s16 = smov %s1576_s25 }
 0x421   :  { %19 = sbr.rel (!%p17_p12) target bundleno = 6 (0x6), region = 106 }
 0x428   :  { %869 = vsyncpa [#allocation7], 1 }
 0x429   :  { %871 = vsyncpa [#allocation7 + $0x1], 1 }
 0x42a   :  { %872 = vsyncpa [#allocation10], 1 }
 0x42b   :  { %873 = vsyncpa [#allocation13], 1 }
 0x42c   :  { %874 = vsyncpa [#allocation8], 1 }
 0x42d   :  { %876 = vsyncpa [#allocation8 + $0x1], 1 }

</bundles_post_ra>
